<compile_context>
chip_gen: v5e
topology: v5e:2x2
jax: 0.10.0
libtpu: 0.0.40
codegen_flags: <defaults>
</compile_context>

<pallas_src>
import math

import jax
import jax.numpy as jnp
from jax.experimental import pallas as pl
from jax.experimental.pallas import tpu as pltpu


def _causal_conv_kernel(x_ref, w_ref, b_ref, o_ref):
    """One row-block grid step.

    x_ref: (T_in,  Rb)  time on sublanes, rows (= flattened N*C) on lanes
    w_ref: (K,     Rb)  per-lane taps (channel pattern tiled over one block);
                        constant index_map -> fetched once, resident in VMEM
    b_ref: (1,     Rb)  per-lane bias (same residency)
    o_ref: (T_out, Rb)  lane-dense output stores
    """
    t_out, rb = o_ref.shape
    k_size = w_ref.shape[0]
    f32 = jnp.float32

    # Bias initializes the accumulator (drops one full VALU pass over the tile).
    acc = jnp.broadcast_to(b_ref[...], (t_out, rb))
    if acc.dtype != f32:
        acc = acc.astype(f32)

    # Unrolled depthwise sliding window.  Each tap is a static sublane slice
    # taken directly from the ref -- no whole-tile materialized upcast/copy,
    # and no lane-axis shifting.
    for k in range(k_size):
        xk = x_ref[pl.ds(k, t_out), :]
        wk = w_ref[pl.ds(k, 1), :]
        if xk.dtype != f32:
            xk = xk.astype(f32)
        if wk.dtype != f32:
            wk = wk.astype(f32)
        acc = acc + xk * wk
    # TODO(synk): on v6e/v7x, store x/out as bf16 in HBM (bf16 multiply, f32
    # accumulate) to ~halve HBM traffic if accuracy allows; keep f32 on v5e.

    o_ref[...] = acc.astype(o_ref.dtype)


def _pick_row_block(r, c, t_in, t_out, k_size, itemsize=4,
                    vmem_budget_bytes=20 * 1024 * 1024,
                    max_lanes=32 * 1024, min_steps=4):
    """Lane-dense, channel-aligned row-block width.

    * multiple of 128 (unmasked lane-dense loads/stores) AND of C (so the
      tiled weight/bias lane pattern is identical for every block),
    * capped so double-buffered x/out blocks + resident w/b stay within a
      VMEM budget that fits all generations (v5e scoped limit raised via
      vmem_limit_bytes; comfortably inside v7x's 64 MiB physical VMEM),
    * capped at ~R/min_steps so large problems keep several grid steps for
      megacore sharding (v7x: 2 TensorCores) and DMA pipeline depth.
    """
    unit = (128 * c) // math.gcd(128, c)
    # double-buffered x + out, single-resident w + b, bytes per lane
    per_lane = (2 * (t_in + t_out) + k_size + 1) * itemsize
    cap = max(unit, min(max_lanes, vmem_budget_bytes // per_lane))
    target = max(unit, pl.cdiv(r, min_steps))
    blk = min(cap, target)
    return max(unit, (blk // unit) * unit)


def causal_temporal_conv_time_major(x_tm, w, b, output_time_len):
    """Preferred interface: time-major activations, no transposes anywhere.

    x_tm: (T_in, R) with R = N*C rows flattened channel-minor (r = n*C + c)
    w   : (C, K)    depthwise taps (PyTorch (C, 1, K) squeezed)
    b   : (C,)
    returns (T_out, R)
    """
    t_in, r = x_tm.shape
    c, k_size = w.shape
    t_out = output_time_len
    assert k_size == t_in - t_out + 1
    assert b.shape == (c,)
    assert r % c == 0, "rows must be flattened channel-minor: R = N * C"

    itemsize = jnp.dtype(x_tm.dtype).itemsize
    r_blk = _pick_row_block(r, c, t_in, t_out, k_size, itemsize=itemsize)
    r_pad = pl.cdiv(r, r_blk) * r_blk
    grid = (r_pad // r_blk,)

    if r_pad != r:
        x_tm = jnp.pad(x_tm, ((0, 0), (0, r_pad - r)))

    # Materialize weight/bias for ONE block only (not (K, N*C) in HBM): the
    # lane pattern repeats every C lanes and every block starts at a multiple
    # of C, so a constant index_map keeps one resident copy in VMEM.
    reps = r_blk // c
    w_blk = jnp.tile(w.T, (1, reps))              # (K, r_blk), lane l -> w[l % C, :]
    b_blk = jnp.tile(b.reshape(1, c), (1, reps))  # (1, r_blk), lane l -> b[l % C]

    cost = pl.CostEstimate(
        flops=2 * k_size * t_out * r,
        transcendentals=0,
        bytes_accessed=(t_in * r + t_out * r + k_size * r_blk + r_blk) * itemsize,
    )

    out_tm = pl.pallas_call(
        _causal_conv_kernel,
        out_shape=jax.ShapeDtypeStruct((t_out, r_pad), x_tm.dtype),
        grid_spec=pltpu.PrefetchScalarGridSpec(
            num_scalar_prefetch=0,
            grid=grid,
            in_specs=[
                pl.BlockSpec((t_in, r_blk), lambda j: (0, j)),
                pl.BlockSpec((k_size, r_blk), lambda j: (0, 0)),  # resident
                pl.BlockSpec((1, r_blk), lambda j: (0, 0)),       # resident
            ],
            out_specs=pl.BlockSpec((t_out, r_blk), lambda j: (0, j)),
        ),
        compiler_params=pltpu.CompilerParams(
            dimension_semantics=("parallel",),
            vmem_limit_bytes=32 * 1024 * 1024,
        ),
        cost_estimate=cost,
    )(x_tm, w_blk, b_blk)

    if r_pad != r:
        out_tm = out_tm[:, :r]
    return out_tm


def causal_temporal_conv(x, w, b, output_time_len):
    """(N, C, T_in) -> (N, C, T_out), matching nn.Conv1d(C, C, K, groups=C).

    Thin layout shim around the time-major core.  In a real pipeline keep
    activations time-major (T, N*C) end-to-end (or let XLA fuse these
    transposes into the producer/consumer) so the two extra HBM passes
    disappear -- the Pallas kernel itself never transposes.
    """
    n, c, t_in = x.shape
    x_tm = x.reshape(n * c, t_in).T                        # (T_in, N*C), channel-minor rows
    out_tm = causal_temporal_conv_time_major(x_tm, w, b, output_time_len)
    return out_tm.T.reshape(n, c, output_time_len)


def _reference(x, w, b, output_time_len):
    """Plain-JAX reference of the depthwise causal conv (for verification)."""
    t_out = output_time_len
    k_size = x.shape[2] - t_out + 1
    out = jnp.broadcast_to(b[None, :, None],
                           (x.shape[0], x.shape[1], t_out)).astype(jnp.float32)
    for k in range(k_size):
        out = out + x[:, :, k:k + t_out] * w[:, k][None, :, None]
    return out


if __name__ == "__main__":
    # Small shapes consistent with the module: no_features=4,
    # input_time_len=16, output_time_len=8  ->  kernel_size K = 9.
    N, C = 2, 4
    INPUT_TIME_LEN, OUTPUT_TIME_LEN = 16, 8
    K = INPUT_TIME_LEN - OUTPUT_TIME_LEN + 1

    key = jax.random.PRNGKey(0)
    kx, kw, kb = jax.random.split(key, 3)
    x = jax.random.normal(kx, (N, C, INPUT_TIME_LEN), dtype=jnp.float32)
    # PyTorch depthwise weight has shape (C, 1, K) -> stored here as (C, K).
    w = jax.random.normal(kw, (C, K), dtype=jnp.float32) * 0.1
    b = jax.random.normal(kb, (C,), dtype=jnp.float32) * 0.1

    out = causal_temporal_conv(x, w, b, OUTPUT_TIME_LEN)
    out = jax.block_until_ready(out)

    ref = _reference(x, w, b, OUTPUT_TIME_LEN)
    assert out.shape == (N, C, OUTPUT_TIME_LEN)
    assert jnp.allclose(out, ref, atol=1e-5, rtol=1e-5)

    print("KERNEL_OK")
</pallas_src>

<mosaic_0001>
module attributes {stable_mosaic.version = 11 : i64} {
  func.func @_causal_conv_kernel(%arg0: i32, %arg1: memref<16x128xf32, #tpu.memory_space<vmem>>, %arg2: memref<9x128xf32, #tpu.memory_space<vmem>>, %arg3: memref<1x128xf32, #tpu.memory_space<vmem>>, %arg4: memref<8x128xf32, #tpu.memory_space<vmem>>) attributes {dimension_semantics = [#tpu.dimension_semantics<parallel>], iteration_bounds = array<i64: 1>, scalar_prefetch = 0 : i64, scratch_operands = 0 : i64, tpu.core_type = #tpu.core_type<tc>, window_params = [{transform_indices = @transform_0, window_bounds = array<i64: 16, 128>}, {pipeline_mode = #tpu.pipeline_mode<synchronous>, transform_indices = @transform_1, window_bounds = array<i64: 9, 128>}, {pipeline_mode = #tpu.pipeline_mode<synchronous>, transform_indices = @transform_2, window_bounds = array<i64: 1, 128>}, {transform_indices = @transform_3, window_bounds = array<i64: 8, 128>}]} {
    %c0 = arith.constant 0 : index
    %c0_0 = arith.constant 0 : index
    %0 = vector.load %arg3[%c0, %c0_0] : memref<1x128xf32, #tpu.memory_space<vmem>>, vector<1x128xf32>
    %1 = vector.shape_cast %0 : vector<1x128xf32> to vector<1x128xf32>
    %2 = vector.broadcast %1 : vector<1x128xf32> to vector<8x128xf32>
    %c0_1 = arith.constant 0 : index
    %c0_2 = arith.constant 0 : index
    %3 = vector.load %arg1[%c0_1, %c0_2] : memref<16x128xf32, #tpu.memory_space<vmem>>, vector<8x128xf32>
    %c0_3 = arith.constant 0 : index
    %c0_4 = arith.constant 0 : index
    %4 = vector.load %arg2[%c0_3, %c0_4] : memref<9x128xf32, #tpu.memory_space<vmem>>, vector<1x128xf32>
    %5 = vector.broadcast %4 : vector<1x128xf32> to vector<8x128xf32>
    %6 = arith.mulf %3, %5 : vector<8x128xf32>
    %7 = arith.addf %2, %6 : vector<8x128xf32>
    %c1 = arith.constant 1 : index
    %c0_5 = arith.constant 0 : index
    %8 = vector.load %arg1[%c1, %c0_5] : memref<16x128xf32, #tpu.memory_space<vmem>>, vector<8x128xf32>
    %c1_6 = arith.constant 1 : index
    %c0_7 = arith.constant 0 : index
    %9 = vector.load %arg2[%c1_6, %c0_7] : memref<9x128xf32, #tpu.memory_space<vmem>>, vector<1x128xf32>
    %10 = vector.broadcast %9 : vector<1x128xf32> to vector<8x128xf32>
    %11 = arith.mulf %8, %10 : vector<8x128xf32>
    %12 = arith.addf %7, %11 : vector<8x128xf32>
    %c2 = arith.constant 2 : index
    %c0_8 = arith.constant 0 : index
    %13 = vector.load %arg1[%c2, %c0_8] : memref<16x128xf32, #tpu.memory_space<vmem>>, vector<8x128xf32>
    %c2_9 = arith.constant 2 : index
    %c0_10 = arith.constant 0 : index
    %14 = vector.load %arg2[%c2_9, %c0_10] : memref<9x128xf32, #tpu.memory_space<vmem>>, vector<1x128xf32>
    %15 = vector.broadcast %14 : vector<1x128xf32> to vector<8x128xf32>
    %16 = arith.mulf %13, %15 : vector<8x128xf32>
    %17 = arith.addf %12, %16 : vector<8x128xf32>
    %c3 = arith.constant 3 : index
    %c0_11 = arith.constant 0 : index
    %18 = vector.load %arg1[%c3, %c0_11] : memref<16x128xf32, #tpu.memory_space<vmem>>, vector<8x128xf32>
    %c3_12 = arith.constant 3 : index
    %c0_13 = arith.constant 0 : index
    %19 = vector.load %arg2[%c3_12, %c0_13] : memref<9x128xf32, #tpu.memory_space<vmem>>, vector<1x128xf32>
    %20 = vector.broadcast %19 : vector<1x128xf32> to vector<8x128xf32>
    %21 = arith.mulf %18, %20 : vector<8x128xf32>
    %22 = arith.addf %17, %21 : vector<8x128xf32>
    %c4 = arith.constant 4 : index
    %c0_14 = arith.constant 0 : index
    %23 = vector.load %arg1[%c4, %c0_14] : memref<16x128xf32, #tpu.memory_space<vmem>>, vector<8x128xf32>
    %c4_15 = arith.constant 4 : index
    %c0_16 = arith.constant 0 : index
    %24 = vector.load %arg2[%c4_15, %c0_16] : memref<9x128xf32, #tpu.memory_space<vmem>>, vector<1x128xf32>
    %25 = vector.broadcast %24 : vector<1x128xf32> to vector<8x128xf32>
    %26 = arith.mulf %23, %25 : vector<8x128xf32>
    %27 = arith.addf %22, %26 : vector<8x128xf32>
    %c5 = arith.constant 5 : index
    %c0_17 = arith.constant 0 : index
    %28 = vector.load %arg1[%c5, %c0_17] : memref<16x128xf32, #tpu.memory_space<vmem>>, vector<8x128xf32>
    %c5_18 = arith.constant 5 : index
    %c0_19 = arith.constant 0 : index
    %29 = vector.load %arg2[%c5_18, %c0_19] : memref<9x128xf32, #tpu.memory_space<vmem>>, vector<1x128xf32>
    %30 = vector.broadcast %29 : vector<1x128xf32> to vector<8x128xf32>
    %31 = arith.mulf %28, %30 : vector<8x128xf32>
    %32 = arith.addf %27, %31 : vector<8x128xf32>
    %c6 = arith.constant 6 : index
    %c0_20 = arith.constant 0 : index
    %33 = vector.load %arg1[%c6, %c0_20] : memref<16x128xf32, #tpu.memory_space<vmem>>, vector<8x128xf32>
    %c6_21 = arith.constant 6 : index
    %c0_22 = arith.constant 0 : index
    %34 = vector.load %arg2[%c6_21, %c0_22] : memref<9x128xf32, #tpu.memory_space<vmem>>, vector<1x128xf32>
    %35 = vector.broadcast %34 : vector<1x128xf32> to vector<8x128xf32>
    %36 = arith.mulf %33, %35 : vector<8x128xf32>
    %37 = arith.addf %32, %36 : vector<8x128xf32>
    %c7 = arith.constant 7 : index
    %c0_23 = arith.constant 0 : index
    %38 = vector.load %arg1[%c7, %c0_23] : memref<16x128xf32, #tpu.memory_space<vmem>>, vector<8x128xf32>
    %c7_24 = arith.constant 7 : index
    %c0_25 = arith.constant 0 : index
    %39 = vector.load %arg2[%c7_24, %c0_25] : memref<9x128xf32, #tpu.memory_space<vmem>>, vector<1x128xf32>
    %40 = vector.broadcast %39 : vector<1x128xf32> to vector<8x128xf32>
    %41 = arith.mulf %38, %40 : vector<8x128xf32>
    %42 = arith.addf %37, %41 : vector<8x128xf32>
    %c8 = arith.constant 8 : index
    %c0_26 = arith.constant 0 : index
    %43 = vector.load %arg1[%c8, %c0_26] : memref<16x128xf32, #tpu.memory_space<vmem>>, vector<8x128xf32>
    %c8_27 = arith.constant 8 : index
    %c0_28 = arith.constant 0 : index
    %44 = vector.load %arg2[%c8_27, %c0_28] : memref<9x128xf32, #tpu.memory_space<vmem>>, vector<1x128xf32>
    %45 = vector.broadcast %44 : vector<1x128xf32> to vector<8x128xf32>
    %46 = arith.mulf %43, %45 : vector<8x128xf32>
    %47 = arith.addf %42, %46 : vector<8x128xf32>
    %c0_29 = arith.constant 0 : index
    %c0_30 = arith.constant 0 : index
    %48 = vector.load %arg4[%c0_29, %c0_30] : memref<8x128xf32, #tpu.memory_space<vmem>>, vector<8x128xf32>
    tpu.vector_store %arg4[%c0_29, %c0_30], %47 {strides = array<i32>} : memref<8x128xf32, #tpu.memory_space<vmem>>, vector<8x128xf32>,
    return
  }
  func.func @transform_0(%arg0: i32) -> (i32, i32) {
    %c0_i32 = arith.constant 0 : i32
    %c0_i32_0 = arith.constant 0 : i32
    return %c0_i32, %arg0 : i32, i32
  }
  func.func @transform_1(%arg0: i32) -> (i32, i32) {
    %c0_i32 = arith.constant 0 : i32
    %c0_i32_0 = arith.constant 0 : i32
    %c0_i32_1 = arith.constant 0 : i32
    return %c0_i32, %c0_i32_0 : i32, i32
  }
  func.func @transform_2(%arg0: i32) -> (i32, i32) {
    %c0_i32 = arith.constant 0 : i32
    %c0_i32_0 = arith.constant 0 : i32
    %c0_i32_1 = arith.constant 0 : i32
    return %c0_i32, %c0_i32_0 : i32, i32
  }
  func.func @transform_3(%arg0: i32) -> (i32, i32) {
    %c0_i32 = arith.constant 0 : i32
    %c0_i32_0 = arith.constant 0 : i32
    return %c0_i32, %arg0 : i32, i32
  }
}

</mosaic_0001>

<bundles_post_ra>
// kernel: tpu_custom_call.1
= control target key start
LH: loop header
LB: loop body
LE: loop exit
PB: predicated region body
PF: predicated region fallthrough
CT: control target
= control target key end

     0   :  { %8 = vsyncpa [#allocation3], 0  ;;  %s245_s0 = inlined_call_operand.hbm [shape: f32[16,128], index: 0, kind: input, shape index: {}]   ;;  %s246_s1 = inlined_call_operand.hbm [shape: f32[9,128], index: 1, kind: input, shape index: {}]   ;;  %s247_s2 = inlined_call_operand.vmem [shape: f32[1,128], index: 2, kind: input, shape index: {}]   ;;  %s248_s3 = inlined_call_operand.hbm [shape: f32[8,128], index: 3, kind: output, shape index: {}]  }
   0x1   :  { %9 = vsyncpa [#allocation6], 0 }
   0x2   :  { %10 = vsyncpa [#allocation4], 0  ;;  %s15_s14 = sshll.u32 %s245_s0, 4  ;;  %s208_s15 = smov [#allocation2]   ;;  %s16_s14 = int_to_ptr.hbm [resolvable:$true] %s15_s14 }
   0x3   :  { %s17_s16 = sshll.u32 %s208_s15, 4  ;;  %s28_s19 = sshll.u32 %s246_s1, 4  ;;  %s18_s16 = int_to_ptr.vmem [resolvable:$true] %s17_s16  ;;  %s29_s19 = int_to_ptr.hbm [resolvable:$true] %s28_s19 }
   0x4   :  { %s209_s20 = smov 128   ;;  %s210_s21 = smov 8  }
   0x5   :  { %23 = dma.hbm_to_vmem [thread:$0]  %s16_s14, 256, %s18_s16, [#allocation3], %s209_s20, %s209_s20, %s210_s21  }
   0x6   :  { %s211_s22 = smov [#allocation5]  }
   0x7   :  { %s30_s23 = sshll.u32 %s211_s22, 4  ;;  %s31_s23 = int_to_ptr.vmem [resolvable:$true] %s30_s23 }
   0x8   :  { %36 = dma.hbm_to_vmem [thread:$0]  %s29_s19, 256, %s31_s23, [#allocation6], %s209_s20, %s209_s20, %s210_s21  }
   0x9   :  { %202 = dma.done.wait [#allocation3], 256  }
   0xa   :  { %203 = vsyncadd [#allocation3], 4294967040 }
   0xb   :  { %204 = dma.done.wait [#allocation6], 256  }
   0xc   :  { %205 = vsyncadd [#allocation6], 4294967040  ;;  %v120_v0 = vld [vmem:[%s247_s2] ss:$0 sm:$0xff]  ;;  %v121_v2 = vld [vmem:[#allocation5] ss:$0 sm:$0xff] }
   0xd   :  { %v51_v1 = vld [vmem:[#allocation2] sm:$0xff]  ;;  %v122_v4 = vld [vmem:[#allocation5 + $0x1] ss:$0 sm:$0xff]  ;;  %v123_v7 = vld [vmem:[#allocation5 + $0x2] ss:$0 sm:$0xff]  ;;  %s212_s1 = smov [#allocation7]  }
   0xe   :  { %v56_v3 = vld [vmem:[#allocation2 + $0x1] sm:$0xff]  ;;  %v54_v6 = vmul.f32 %v121_v2, %v51_v1  ;;  %v124_v10 = vld [vmem:[#allocation5 + $0x3] ss:$0 sm:$0xff]  ;;  %v125_v13 = vld [vmem:[#allocation5 + $0x4] ss:$0 sm:$0xff]  ;;  %s102_s2 = sshll.u32 %s212_s1, 4  ;;  %s103_s2 = int_to_ptr.vmem [resolvable:$true] %s102_s2 }
   0xf   :  { %v61_v5 = vld [vmem:[#allocation2 + $0x2] sm:$0xff]  ;;  %v59_v8 = vmul.f32 %v122_v4, %v56_v3  ;;  %v126_v17 = vld [vmem:[#allocation5 + $0x5] ss:$0 sm:$0xff]  ;;  %v127_v21 = vld [vmem:[#allocation5 + $0x6] ss:$0 sm:$0xff]  ;;  %s104_s27 = sshll.u32 %s248_s3, 4  ;;  %s105_s27 = int_to_ptr.hbm [resolvable:$true] %s104_s27 }
  0x10   :  { %v66_v9 = vld [vmem:[#allocation2 + $0x3] sm:$0xff]  ;;  %v55_v11 = vadd.f32 %v120_v0, %v54_v6  ;;  %v64_v12 = vmul.f32 %v123_v7, %v61_v5  ;;  %v128_v25 = vld [vmem:[#allocation5 + $0x7] ss:$0 sm:$0xff]  ;;  %v129_v29 = vld [vmem:[#allocation5 + $0x8] ss:$0 sm:$0xff] }
  0x11   :  { %v71_v14 = vld [vmem:[#allocation2 + $0x4] sm:$0xff]  ;;  %v69_v16 = vmul.f32 %v124_v10, %v66_v9 }
  0x12   :  { %v60_v15 = vadd.f32 %v59_v8, %v55_v11  ;;  %v76_v18 = vld [vmem:[#allocation2 + $0x5] sm:$0xff]  ;;  %v74_v20 = vmul.f32 %v125_v13, %v71_v14 }
  0x13   :  { %v81_v22 = vld [vmem:[#allocation2 + $0x6] sm:$0xff]  ;;  %v79_v24 = vmul.f32 %v126_v17, %v76_v18 }
  0x14   :  { %v65_v19 = vadd.f32 %v64_v12, %v60_v15  ;;  %v86_v26 = vld [vmem:[#allocation2 + $0x7] sm:$0xff]  ;;  %v84_v28 = vmul.f32 %v127_v21, %v81_v22 }
  0x15   :  { %v91_v30 = vld [vmem:[#allocation2 + $0x8] sm:$0xff]  ;;  %v89_v32 = vmul.f32 %v128_v25, %v86_v26 }
  0x16   :  { %v70_v23 = vadd.f32 %v69_v16, %v65_v19  ;;  %v94_v34 = vmul.f32 %v129_v29, %v91_v30 }
  0x18   :  { %v75_v27 = vadd.f32 %v74_v20, %v70_v23 }
  0x1a   :  { %v80_v31 = vadd.f32 %v79_v24, %v75_v27 }
  0x1c   :  { %v85_v33 = vadd.f32 %v84_v28, %v80_v31 }
  0x1e   :  { %v90_v35 = vadd.f32 %v89_v32, %v85_v33 }
  0x20   :  { %v95_v36 = vadd.f32 %v94_v34, %v90_v35 }
  0x22   :  { %96 = vst [vmem:[#allocation7] sm:$0xff] %v95_v36 }
  0x23   :  { %107 = dma.vmem_to_hbm [thread:$0]  %s103_s2, 128, %s105_s27, [#allocation4]  }
  0x24   :  { %206 = dma.done.wait [#allocation4], 128  }
  0x25   :  { %207 = vsyncadd [#allocation4], 4294967168 }
  0x26   :  { %112 = vsyncpa [#allocation3], 1 }
  0x27   :  { %113 = vsyncpa [#allocation6], 1 }
  0x28   :  { %114 = vsyncpa [#allocation4], 1 }

</bundles_post_ra>
